<compile_context>
chip_gen: v6e
topology: v6e:2x2x1
jax: 0.10.0
libtpu: 0.0.40
codegen_flags: <defaults>
</compile_context>

<pallas_src>
import jax
import jax.numpy as jnp
from jax.experimental import pallas as pl
from jax.experimental.pallas import tpu as pltpu


def _round_up(n, m):
    return ((n + m - 1) // m) * m


def _pad2d(a, rows, cols, value=0.0):
    r, c = a.shape
    return jnp.pad(a, ((0, rows - r), (0, cols - c)), constant_values=value)


def actor_kernel(x_ref, w1_ref, b1_ref, w2_ref, b2_ref, w3_ref, b3_ref, o_ref):
    # x arrives as unpadded f32; cast to bf16 in-kernel (cheap VPU op, overlapped).
    x = x_ref[...].astype(jnp.bfloat16)

    # fc1 + ReLU  (bf16 MXU, f32 accumulate, f32 epilogue)
    h1 = jnp.dot(x, w1_ref[...], preferred_element_type=jnp.float32) + b1_ref[...]
    h1 = jnp.maximum(h1, 0.0)

    # fc2 + ReLU
    h2 = jnp.dot(h1.astype(jnp.bfloat16), w2_ref[...],
                 preferred_element_type=jnp.float32) + b2_ref[...]
    h2 = jnp.maximum(h2, 0.0)

    # out + softmax(dim=1).  Padded action columns carry a -1e30 bias baked in
    # prepare_params (padded w3 columns are zero), so no iota/where mask needed:
    # exp(pad - m) == 0 exactly and the padded probabilities come out as 0.
    logits = jnp.dot(h2.astype(jnp.bfloat16), w3_ref[...],
                     preferred_element_type=jnp.float32) + b3_ref[...]

    # TODO(synk): if profiles ever show EUP/XLU saturating, do the softmax in a
    # sublane-major layout (actions on sublanes) to skip padded-lane exp work.
    m = jnp.max(logits, axis=-1, keepdims=True)
    e = jnp.exp(logits - m)
    denom = jnp.sum(e, axis=-1, keepdims=True)
    # EUP approx reciprocal instead of a full-precision VPU divide.
    o_ref[...] = (e * pl.reciprocal(denom, approx=True)).astype(o_ref.dtype)


def init_params(key, feature_nums, neuron_nums, action_nums):
    """Synthetic init mirroring the PyTorch module (weights ~ N(0, 0.1)).
    Weights stored transposed: (in_features, out_features)."""
    k1, k2, k3 = jax.random.split(key, 3)
    return {
        "w1": 0.1 * jax.random.normal(k1, (feature_nums, neuron_nums), jnp.float32),
        "b1": jnp.full((1, neuron_nums), 0.01, jnp.float32),
        "w2": 0.1 * jax.random.normal(k2, (neuron_nums, neuron_nums), jnp.float32),
        "b2": jnp.full((1, neuron_nums), 0.01, jnp.float32),
        "w3": 0.1 * jax.random.normal(k3, (neuron_nums, action_nums), jnp.float32),
        "b3": jnp.full((1, action_nums), 0.01, jnp.float32),
    }


def prepare_params(params):
    """Pad weights/biases to lane-aligned widths and cast weights to bf16 ONCE.
    w1 is left UNPADDED along K (feature axis); b3's padded columns get -1e30
    so the softmax mask is baked into the bias."""
    w1, b1 = params["w1"], params["b1"]
    w2, b2 = params["w2"], params["b2"]
    w3, b3 = params["w3"], params["b3"]
    feature_nums, neuron_nums = w1.shape
    action_nums = w3.shape[1]

    hp = _round_up(neuron_nums, 128)
    ap = _round_up(action_nums, 128)

    return {
        "w1": _pad2d(w1, feature_nums, hp).astype(jnp.bfloat16),  # K unpadded
        "b1": _pad2d(b1, 1, hp),                 # biases stay f32 (v5e epilogue)
        "w2": _pad2d(w2, hp, hp).astype(jnp.bfloat16),
        "b2": _pad2d(b2, 1, hp),
        "w3": _pad2d(w3, hp, ap).astype(jnp.bfloat16),
        "b3": _pad2d(b3, 1, ap, value=-1e30),    # mask baked into bias padding
        "dims": (feature_nums, neuron_nums, action_nums),
    }


def actor_net_forward(x, prepared, *, tb_max=1024):
    """x: (batch, feature_nums) f32.  prepared: output of prepare_params."""
    feature_nums, _, action_nums = prepared["dims"]
    batch = x.shape[0]

    fn = prepared["w1"].shape[0]     # = feature_nums (unpadded K)
    hp = prepared["w1"].shape[1]
    ap = prepared["w3"].shape[1]

    # 16-row alignment: keeps bf16 output sublanes fully packed; also fine for
    # the f32 x DMA.  Batch is padded only to a multiple of 16 (not of tb).
    SUB = 16
    tb = _round_up(pl.cdiv(batch, 2), SUB)       # aim for >=2 grid steps (v7x 2 TCs)
    tb = max(SUB, min(tb, tb_max))               # sweep tb_max 1024-2048 on v5e/v6e
    bp = _round_up(batch, SUB)
    grid = pl.cdiv(bp, tb)                       # ragged last block handled by Pallas

    x_in = x if bp == batch else jnp.pad(x, ((0, bp - batch), (0, 0)))

    # Resident-weights VMEM guard: constant index_map blocks are still
    # double-buffered by default; single-buffer them once they get large
    # (matters first on v7x's 64 MiB VMEM).  Irrelevant at hp == 128.
    weight_kwargs = {}
    if hp >= 1024:
        weight_kwargs["pipeline_mode"] = pl.Buffered(1)

    out = pl.pallas_call(
        actor_kernel,
        out_shape=jax.ShapeDtypeStruct((bp, ap), jnp.bfloat16),   # bf16: half the write bytes
        grid=(grid,),
        in_specs=[
            pl.BlockSpec((tb, feature_nums), lambda i: (i, 0)),   # x: f32, unpadded K
            pl.BlockSpec((fn, hp), lambda i: (0, 0), **weight_kwargs),  # w1 resident
            pl.BlockSpec((1, hp), lambda i: (0, 0)),                    # b1
            pl.BlockSpec((hp, hp), lambda i: (0, 0), **weight_kwargs),  # w2 resident
            pl.BlockSpec((1, hp), lambda i: (0, 0)),                    # b2
            pl.BlockSpec((hp, ap), lambda i: (0, 0), **weight_kwargs),  # w3 resident
            pl.BlockSpec((1, ap), lambda i: (0, 0)),                    # b3 (masked pad)
        ],
        out_specs=pl.BlockSpec((tb, ap), lambda i: (i, 0)),       # lane-dense output
        compiler_params=pltpu.CompilerParams(
            dimension_semantics=("parallel",),   # v7x: shard batch over both TCs
        ),
    )(x_in, prepared["w1"], prepared["b1"], prepared["w2"], prepared["b2"],
      prepared["w3"], prepared["b3"])

    # Tiny (batch, action_nums) slice; no further ops touch the padded slab.
    return out[:batch, :action_nums].astype(jnp.float32)


def _reference_forward(x, params):
    h1 = jnp.maximum(x @ params["w1"] + params["b1"], 0.0)
    h2 = jnp.maximum(h1 @ params["w2"] + params["b2"], 0.0)
    logits = h2 @ params["w3"] + params["b3"]
    return jax.nn.softmax(logits, axis=1)


if __name__ == "__main__":
    # Small shapes consistent with the module: batch=8, feature_nums=16,
    # neuron_nums (config['neuron_nums'])=32, action_nums=4.
    batch, feature_nums, neuron_nums, action_nums = 8, 16, 32, 4

    key = jax.random.PRNGKey(0)
    k_x, k_p = jax.random.split(key)
    x = jax.random.normal(k_x, (batch, feature_nums), jnp.float32)
    params = init_params(k_p, feature_nums, neuron_nums, action_nums)

    prepared = prepare_params(params)      # pad + bf16 cast once, reuse per call
    action_prob = actor_net_forward(x, prepared)
    action_prob = jax.block_until_ready(action_prob)

    # Sanity checks (bf16 matmuls/output + approx reciprocal -> ~1e-3..1e-2 tol).
    ref = _reference_forward(x, params)
    assert action_prob.shape == (batch, action_nums)
    assert jnp.allclose(jnp.sum(action_prob, axis=1), 1.0, atol=1e-2)
    assert jnp.allclose(action_prob, ref, atol=2e-2)

    print("KERNEL_OK")
</pallas_src>

<mosaic_0001>
module attributes {stable_mosaic.version = 11 : i64} {
  func.func @actor_kernel(%arg0: i32, %arg1: memref<16x16xf32, #tpu.memory_space<vmem>>, %arg2: memref<16x128xbf16, #tpu.memory_space<vmem>>, %arg3: memref<1x128xf32, #tpu.memory_space<vmem>>, %arg4: memref<128x128xbf16, #tpu.memory_space<vmem>>, %arg5: memref<1x128xf32, #tpu.memory_space<vmem>>, %arg6: memref<128x128xbf16, #tpu.memory_space<vmem>>, %arg7: memref<1x128xf32, #tpu.memory_space<vmem>>, %arg8: memref<16x128xbf16, #tpu.memory_space<vmem>>) attributes {dimension_semantics = [#tpu.dimension_semantics<parallel>], iteration_bounds = array<i64: 1>, scalar_prefetch = 0 : i64, scratch_operands = 0 : i64, tpu.core_type = #tpu.core_type<tc>, window_params = [{transform_indices = @transform_0, window_bounds = array<i64: 16, 16>}, {pipeline_mode = #tpu.pipeline_mode<synchronous>, transform_indices = @transform_1, window_bounds = array<i64: 16, 128>}, {pipeline_mode = #tpu.pipeline_mode<synchronous>, transform_indices = @transform_2, window_bounds = array<i64: 1, 128>}, {pipeline_mode = #tpu.pipeline_mode<synchronous>, transform_indices = @transform_3, window_bounds = array<i64: 128, 128>}, {pipeline_mode = #tpu.pipeline_mode<synchronous>, transform_indices = @transform_4, window_bounds = array<i64: 1, 128>}, {pipeline_mode = #tpu.pipeline_mode<synchronous>, transform_indices = @transform_5, window_bounds = array<i64: 128, 128>}, {pipeline_mode = #tpu.pipeline_mode<synchronous>, transform_indices = @transform_6, window_bounds = array<i64: 1, 128>}, {transform_indices = @transform_7, window_bounds = array<i64: 16, 128>}]} {
    %c0 = arith.constant 0 : index
    %c0_0 = arith.constant 0 : index
    %0 = vector.load %arg1[%c0, %c0_0] : memref<16x16xf32, #tpu.memory_space<vmem>>, vector<16x16xf32>
    %1 = arith.truncf %0 : vector<16x16xf32> to vector<16x16xbf16>
    %c0_1 = arith.constant 0 : index
    %c0_2 = arith.constant 0 : index
    %2 = vector.load %arg2[%c0_1, %c0_2] : memref<16x128xbf16, #tpu.memory_space<vmem>>, vector<16x128xbf16>
    %cst = arith.constant dense<0.000000e+00> : vector<16x128xf32>
    %3 = tpu.matmul %1, %2, %cst {dimension_numbers = #tpu.dot_dimension_numbers<[1], [0], [0], [1], [0, 0, 1, 1], [], []>} : vector<16x16xbf16>, vector<16x128xbf16>, vector<16x128xf32> -> vector<16x128xf32>
    %c0_3 = arith.constant 0 : index
    %c0_4 = arith.constant 0 : index
    %4 = vector.load %arg3[%c0_3, %c0_4] : memref<1x128xf32, #tpu.memory_space<vmem>>, vector<1x128xf32>
    %5 = vector.broadcast %4 : vector<1x128xf32> to vector<16x128xf32>
    %6 = arith.addf %3, %5 : vector<16x128xf32>
    %cst_5 = arith.constant 0.000000e+00 : f32
    %7 = vector.broadcast %cst_5 : f32 to vector<16x128xf32>
    %8 = arith.maximumf %6, %7 : vector<16x128xf32>
    %9 = arith.truncf %8 : vector<16x128xf32> to vector<16x128xbf16>
    %c0_6 = arith.constant 0 : index
    %c0_7 = arith.constant 0 : index
    %10 = vector.load %arg4[%c0_6, %c0_7] : memref<128x128xbf16, #tpu.memory_space<vmem>>, vector<128x128xbf16>
    %cst_8 = arith.constant dense<0.000000e+00> : vector<16x128xf32>
    %11 = tpu.matmul %9, %10, %cst_8 {dimension_numbers = #tpu.dot_dimension_numbers<[1], [0], [0], [1], [0, 0, 1, 1], [], []>} : vector<16x128xbf16>, vector<128x128xbf16>, vector<16x128xf32> -> vector<16x128xf32>
    %c0_9 = arith.constant 0 : index
    %c0_10 = arith.constant 0 : index
    %12 = vector.load %arg5[%c0_9, %c0_10] : memref<1x128xf32, #tpu.memory_space<vmem>>, vector<1x128xf32>
    %13 = vector.broadcast %12 : vector<1x128xf32> to vector<16x128xf32>
    %14 = arith.addf %11, %13 : vector<16x128xf32>
    %cst_11 = arith.constant 0.000000e+00 : f32
    %15 = vector.broadcast %cst_11 : f32 to vector<16x128xf32>
    %16 = arith.maximumf %14, %15 : vector<16x128xf32>
    %17 = arith.truncf %16 : vector<16x128xf32> to vector<16x128xbf16>
    %c0_12 = arith.constant 0 : index
    %c0_13 = arith.constant 0 : index
    %18 = vector.load %arg6[%c0_12, %c0_13] : memref<128x128xbf16, #tpu.memory_space<vmem>>, vector<128x128xbf16>
    %cst_14 = arith.constant dense<0.000000e+00> : vector<16x128xf32>
    %19 = tpu.matmul %17, %18, %cst_14 {dimension_numbers = #tpu.dot_dimension_numbers<[1], [0], [0], [1], [0, 0, 1, 1], [], []>} : vector<16x128xbf16>, vector<128x128xbf16>, vector<16x128xf32> -> vector<16x128xf32>
    %c0_15 = arith.constant 0 : index
    %c0_16 = arith.constant 0 : index
    %20 = vector.load %arg7[%c0_15, %c0_16] : memref<1x128xf32, #tpu.memory_space<vmem>>, vector<1x128xf32>
    %21 = vector.broadcast %20 : vector<1x128xf32> to vector<16x128xf32>
    %22 = arith.addf %19, %21 : vector<16x128xf32>
    %cst_17 = arith.constant dense<0xFF800000> : vector<16xf32>
    %23 = vector.multi_reduction <maximumf>, %22, %cst_17 [1] : vector<16x128xf32> to vector<16xf32>
    %24 = vector.shape_cast %23 : vector<16xf32> to vector<16x1xf32>
    %25 = vector.broadcast %24 : vector<16x1xf32> to vector<16x128xf32>
    %26 = arith.subf %22, %25 : vector<16x128xf32>
    %27 = math.exp %26 : vector<16x128xf32>
    %cst_18 = arith.constant dense<0.000000e+00> : vector<16xf32>
    %28 = vector.multi_reduction <add>, %27, %cst_18 [1] : vector<16x128xf32> to vector<16xf32>
    %29 = vector.shape_cast %28 : vector<16xf32> to vector<16x1xf32>
    %30 = tpu.reciprocal %29 {approx = true} : vector<16x1xf32> -> vector<16x1xf32>
    %31 = vector.broadcast %30 : vector<16x1xf32> to vector<16x128xf32>
    %32 = arith.mulf %27, %31 : vector<16x128xf32>
    %33 = arith.truncf %32 : vector<16x128xf32> to vector<16x128xbf16>
    %c0_19 = arith.constant 0 : index
    %c0_20 = arith.constant 0 : index
    %34 = vector.load %arg8[%c0_19, %c0_20] : memref<16x128xbf16, #tpu.memory_space<vmem>>, vector<16x128xbf16>
    tpu.vector_store %arg8[%c0_19, %c0_20], %33 {strides = array<i32>} : memref<16x128xbf16, #tpu.memory_space<vmem>>, vector<16x128xbf16>,
    return
  }
  func.func @transform_0(%arg0: i32) -> (i32, i32) {
    %c0_i32 = arith.constant 0 : i32
    %c0_i32_0 = arith.constant 0 : i32
    return %arg0, %c0_i32 : i32, i32
  }
  func.func @transform_1(%arg0: i32) -> (i32, i32) {
    %c0_i32 = arith.constant 0 : i32
    %c0_i32_0 = arith.constant 0 : i32
    %c0_i32_1 = arith.constant 0 : i32
    return %c0_i32, %c0_i32_0 : i32, i32
  }
  func.func @transform_2(%arg0: i32) -> (i32, i32) {
    %c0_i32 = arith.constant 0 : i32
    %c0_i32_0 = arith.constant 0 : i32
    %c0_i32_1 = arith.constant 0 : i32
    return %c0_i32, %c0_i32_0 : i32, i32
  }
  func.func @transform_3(%arg0: i32) -> (i32, i32) {
    %c0_i32 = arith.constant 0 : i32
    %c0_i32_0 = arith.constant 0 : i32
    %c0_i32_1 = arith.constant 0 : i32
    return %c0_i32, %c0_i32_0 : i32, i32
  }
  func.func @transform_4(%arg0: i32) -> (i32, i32) {
    %c0_i32 = arith.constant 0 : i32
    %c0_i32_0 = arith.constant 0 : i32
    %c0_i32_1 = arith.constant 0 : i32
    return %c0_i32, %c0_i32_0 : i32, i32
  }
  func.func @transform_5(%arg0: i32) -> (i32, i32) {
    %c0_i32 = arith.constant 0 : i32
    %c0_i32_0 = arith.constant 0 : i32
    %c0_i32_1 = arith.constant 0 : i32
    return %c0_i32, %c0_i32_0 : i32, i32
  }
  func.func @transform_6(%arg0: i32) -> (i32, i32) {
    %c0_i32 = arith.constant 0 : i32
    %c0_i32_0 = arith.constant 0 : i32
    %c0_i32_1 = arith.constant 0 : i32
    return %c0_i32, %c0_i32_0 : i32, i32
  }
  func.func @transform_7(%arg0: i32) -> (i32, i32) {
    %c0_i32 = arith.constant 0 : i32
    %c0_i32_0 = arith.constant 0 : i32
    return %arg0, %c0_i32 : i32, i32
  }
}

</mosaic_0001>

<bundles_post_ra>
// kernel: tpu_custom_call.1
= control target key start
LH: loop header
LB: loop body
LE: loop exit
PB: predicated region body
PF: predicated region fallthrough
CT: control target
= control target key end

     0   :  { %12 = vsyncpa [#allocation3], 0  ;;  %s773_s0 = inlined_call_operand.hbm [shape: f32[16,16], index: 0, kind: input, shape index: {}]   ;;  %s774_s1 = inlined_call_operand.hbm [shape: bf16[16,128], index: 1, kind: input, shape index: {}]   ;;  %s775_s2 = inlined_call_operand.vmem [shape: f32[1,128], index: 2, kind: input, shape index: {}]   ;;  %s776_s3 = inlined_call_operand.hbm [shape: bf16[128,128], index: 3, kind: input, shape index: {}]   ;;  %s777_s4 = inlined_call_operand.vmem [shape: f32[1,128], index: 4, kind: input, shape index: {}]   ;;  %s778_s5 = inlined_call_operand.hbm [shape: bf16[128,128], index: 5, kind: input, shape index: {}]   ;;  %s779_s6 = inlined_call_operand.vmem [shape: f32[1,128], index: 6, kind: input, shape index: {}]   ;;  %s780_s7 = inlined_call_operand.hbm [shape: bf16[16,128], index: 7, kind: output, shape index: {}]  }
   0x1   :  { %13 = vsyncpa [#allocation6], 0 }
   0x2   :  { %14 = vsyncpa [#allocation9], 0 }
   0x3   :  { %15 = vsyncpa [#allocation4], 0  ;;  %s663_s24 = smov [#allocation5]  }
   0x4   :  { %s33_s25 = sshll.u32 %s663_s24, 4  ;;  %s34_s25 = int_to_ptr.vmem [resolvable:$true] %s33_s25 }
   0x5   :  { %s563_s26 = scalar_lea.vmem %s34_s25, 128  ;;  %p568_p1 = scmp.lt.s32.totalorder %s34_s25, %s34_s25 }
   0x6   :  { %p564_p0 = scmp.ne.s32.totalorder %s34_s25, %s563_s26  ;;  %p569_p2 = scmp.lt.s32.totalorder %s563_s26, %s563_s26 }
   0x8   :  { %p570_p3 = por %p569_p2, %p568_p1 }
   0xa   :  { %p571_p4 = pnand %p570_p3, %p564_p0 }
   0xc   :  { %574 = shalt.err (!%p571_p4)
}
   0xd   :  { %s664_s27 = smov 64   ;;  %s665_s28 = smov 4  }
   0xe   :  { %39 = dma.hbm_to_vmem [thread:$0]  %s774_s1, 128, %s34_s25, [#allocation6], %s664_s27, %s664_s27, %s665_s28  }
   0xf   :  { %s666_s8 = smov [#allocation2]  }
  0x10   :  { %s21_s9 = sshll.u32 %s666_s8, 4  ;;  %s22_s9 = int_to_ptr.vmem [resolvable:$true] %s21_s9 }
  0x11   :  { %s583_s10 = scalar_lea.vmem %s22_s9, 256  ;;  %p588_p6 = scmp.lt.s32.totalorder %s22_s9, %s22_s9 }
  0x12   :  { %p584_p5 = scmp.ne.s32.totalorder %s22_s9, %s583_s10  ;;  %p589_p7 = scmp.lt.s32.totalorder %s583_s10, %s583_s10 }
  0x14   :  { %p590_p8 = por %p589_p7, %p588_p6 }
  0x16   :  { %p591_p9 = pnand %p590_p8, %p584_p5 }
  0x18   :  { %594 = shalt.err (!%p591_p9)
}
  0x19   :  { %s667_s11 = smov 128   ;;  %s668_s12 = smov 8  }
  0x1a   :  { %27 = dma.hbm_to_vmem [thread:$0]  %s773_s0, 256, %s22_s9, [#allocation3], %s667_s11, %s667_s11, %s668_s12  }
  0x1b   :  { %s669_s15 = smov [#allocation7]   ;;  %s670_s17 = smov [#allocation8]  }
  0x1c   :  { %s47_s16 = sshll.u32 %s669_s15, 4  ;;  %s61_s1 = sshll.u32 %s670_s17, 4  ;;  %s48_s16 = int_to_ptr.vmem [resolvable:$true] %s47_s16  ;;  %s62_s1 = int_to_ptr.vmem [resolvable:$true] %s61_s1 }
  0x1d   :  { %s603_s18 = scalar_lea.vmem %s48_s16, 1024  ;;  %p608_p11 = scmp.lt.s32.totalorder %s48_s16, %s48_s16 }
  0x1e   :  { %p604_p10 = scmp.ne.s32.totalorder %s48_s16, %s603_s18  ;;  %p609_p12 = scmp.lt.s32.totalorder %s603_s18, %s603_s18 }
  0x20   :  { %p610_p13 = por %p609_p12, %p608_p11 }
  0x22   :  { %p611_p0 = pnand %p610_p13, %p604_p10 }
  0x24   :  { %614 = shalt.err (!%p611_p0)
}
  0x25   :  { %53 = dma.hbm_to_vmem [thread:$0]  %s776_s3, 1024, %s48_s16, [#allocation6], %s664_s27, %s664_s27, %s665_s28  }
  0x26   :  { %s623_s0 = scalar_lea.vmem %s62_s1, 1024  ;;  %p628_p2 = scmp.lt.s32.totalorder %s62_s1, %s62_s1 }
  0x27   :  { %p624_p1 = scmp.ne.s32.totalorder %s62_s1, %s623_s0  ;;  %p629_p3 = scmp.lt.s32.totalorder %s623_s0, %s623_s0 }
  0x29   :  { %p630_p4 = por %p629_p3, %p628_p2 }
  0x2b   :  { %p631_p5 = pnand %p630_p4, %p624_p1 }
  0x2d   :  { %634 = shalt.err (!%p631_p5)
}
  0x2e   :  { %67 = dma.hbm_to_vmem [thread:$0]  %s778_s5, 1024, %s62_s1, [#allocation9], %s664_s27, %s664_s27, %s665_s28  }
  0x2f   :  { %655 = dma.done.wait [#allocation3], 256  }
  0x30   :  { %656 = vsyncadd [#allocation3], 4294967040 }
  0x31   :  { %657 = dma.done.wait [#allocation6], 1152  }
  0x32   :  { %658 = vsyncadd [#allocation6], 4294966144 }
  0x33   :  { %659 = dma.done.wait [#allocation9], 1024  }
  0x34   :  { %660 = vsyncadd [#allocation9], 4294966272  ;;  %v671_v0 = vmov 0.0   ;;  %vm672_vm0 = vmmov 0   ;;  %v530_v1 = vld [vmem:[#allocation5] sm:$0xff]   ;;  %v83_v2 = vld [vmem:[#allocation2] sm:$0xff] }
  0x35   :  { %473 = vmatprep.subr.bf16.mxu0 %v671_v0  ;;  %475 = vmatprep.mubr.msk.bf16.mxu0 %vm672_vm0, %v671_v0  ;;  %v84_v3 = vld [vmem:[#allocation2 + $0x8] sm:$0xff]  ;;  %vm101_vm1 = vcmask 130048   ;;  %v531_v5 = vld [vmem:[#allocation7 + $0x38] sm:$0xff]   ;;  %v533_v7 = vld [vmem:[#allocation7 + $0x28] sm:$0xff]  }
  0x36   :  { %479 = vmatprep.subr.bf16.mxu1 %v671_v0  ;;  %495 = vmatprep.mubr.msk.bf16.mxu1 %vm672_vm0, %v671_v0  ;;  %v85_v4 = vpack.c.bf16 %v84_v3, %v83_v2  ;;  %v532_v6 = vld [vmem:[#allocation7 + $0x30] sm:$0xff]   ;;  %v534_v8 = vld [vmem:[#allocation7 + $0x20] sm:$0xff]   ;;  %v535_v9 = vld [vmem:[#allocation7 + $0x18] sm:$0xff]  }
  0x37   :  { %474 = vmatpush3.bf16.msra.mxu0 %v530_v1  ;;  %480 = vmatpush3.bf16.msra.mxu1 %v531_v5  ;;  %v536_v10 = vld [vmem:[#allocation7 + $0x10] sm:$0xff]   ;;  %v537_v11 = vld [vmem:[#allocation7 + $0x8] sm:$0xff]   ;;  %v538_v12 = vld [vmem:[#allocation7] sm:$0xff]  }
  0x38   :  { %499 = vmatprep.subr.bf16.mxu0 %v671_v0  ;;  %481 = vmatprep.subr.bf16.mxu1 %v671_v0  ;;  %v539_v13 = vld [vmem:[#allocation8 + $0x38] sm:$0xff]   ;;  %v540_v14 = vld [vmem:[#allocation8 + $0x30] sm:$0xff]   ;;  %v541_v15 = vld [vmem:[#allocation8 + $0x28] sm:$0xff]  }
  0x39   :  { %v542_v16 = vld [vmem:[#allocation8 + $0x20] sm:$0xff]   ;;  %v543_v17 = vld [vmem:[#allocation8 + $0x18] sm:$0xff]   ;;  %v423_v18 = vld [vmem:[%s775_s2] ss:$0 sm:$0xff] }
  0x3a   :  { %476 = vmatmul.mubr.msk.bf16.vlgmr.msra.gmra.mxu0 %vm101_vm1, %v85_v4  ;;  %v544_v28 = vld [vmem:[#allocation8 + $0x10] sm:$0xff]   ;;  %v545_v29 = vld [vmem:[#allocation8 + $0x8] sm:$0xff]   ;;  %v546_v30 = vld [vmem:[#allocation8] sm:$0xff]  }
  0x3b   :  { %515 = vmatprep.mubr.msk.bf16.mxu0 %vm672_vm0, %v671_v0  ;;  %482 = vmatpush3.bf16.msra.mxu1 %v532_v6  ;;  %v426_v31 = vld [vmem:[%s777_s4] ss:$0 sm:$0xff]  ;;  %s673_s4 = smov [#allocation10]  }
  0x3c   :  { %483 = vmatprep.subr.bf16.mxu1 %v671_v0  ;;  %500 = vmatpush3.bf16.msra.mxu0 %v539_v13  ;;  %v435_v41 = vld [vmem:[%s779_s6] ss:$0 sm:$0xff]  ;;  %s409_s6 = sshll.u32 %s673_s4, 4  ;;  %s410_s6 = int_to_ptr.vmem [resolvable:$true] %s409_s6 }
  0x3d   :  { %501 = vmatprep.subr.bf16.mxu0 %v671_v0  ;;  %s635_s26 = scalar_lea.vmem %s410_s6, 128  ;;  %p640_p7 = scmp.lt.s32.totalorder %s410_s6, %s410_s6 }
  0x3e   :  { %p636_p6 = scmp.ne.s32.totalorder %s410_s6, %s635_s26  ;;  %p641_p8 = scmp.lt.s32.totalorder %s635_s26, %s635_s26 }
  0x3f   :  { %484 = vmatpush3.bf16.msra.mxu1 %v533_v7 }
  0x40   :  { %485 = vmatprep.subr.bf16.mxu1 %v671_v0  ;;  %502 = vmatpush3.bf16.msra.mxu0 %v540_v14  ;;  %p642_p9 = por %p641_p8, %p640_p7 }
  0x41   :  { %503 = vmatprep.subr.bf16.mxu0 %v671_v0 }
  0x42   :  { %p643_p10 = pnand %p642_p9, %p636_p6 }
  0x43   :  { %486 = vmatpush3.bf16.msra.mxu1 %v534_v8 }
  0x44   :  { %487 = vmatprep.subr.bf16.mxu1 %v671_v0  ;;  %504 = vmatpush3.bf16.msra.mxu0 %v541_v15 }
  0x45   :  { %505 = vmatprep.subr.bf16.mxu0 %v671_v0 }
  0x47   :  { %488 = vmatpush3.bf16.msra.mxu1 %v535_v9 }
  0x48   :  { %489 = vmatprep.subr.bf16.mxu1 %v671_v0  ;;  %506 = vmatpush3.bf16.msra.mxu0 %v542_v16 }
  0x49   :  { %507 = vmatprep.subr.bf16.mxu0 %v671_v0 }
  0x4b   :  { %490 = vmatpush3.bf16.msra.mxu1 %v536_v10 }
  0x4c   :  { %491 = vmatprep.subr.bf16.mxu1 %v671_v0  ;;  %508 = vmatpush3.bf16.msra.mxu0 %v543_v17 }
  0x4d   :  { %509 = vmatprep.subr.bf16.mxu0 %v671_v0 }
  0x4f   :  { %492 = vmatpush3.bf16.msra.mxu1 %v537_v11 }
  0x50   :  { %493 = vmatprep.subr.bf16.mxu1 %v671_v0  ;;  %510 = vmatpush3.bf16.msra.mxu0 %v544_v28 }
  0x51   :  { %511 = vmatprep.subr.bf16.mxu0 %v671_v0 }
  0x53   :  { %494 = vmatpush3.bf16.msra.mxu1 %v538_v12 }
  0x54   :  { %512 = vmatpush3.bf16.msra.mxu0 %v545_v29 }
  0x55   :  { %513 = vmatprep.subr.bf16.mxu0 %v671_v0 }
  0x58   :  { %514 = vmatpush3.bf16.msra.mxu0 %v546_v30 }
  0xfa   :  { %v139_v19 = vpop.f32.mrf.mxu0 }
  0xfb   :  { %v140_v21 = vadd.f32 %v423_v18, %v139_v19 }
  0xfc   :  { %v477_v20 = vpop.f32.mrf.mxu0 }
  0xfd   :  { %v146_v25 = vmax.f32 %v140_v21, 0.0 }
  0xfe   :  { %v142_v22 = vpop.f32.mrf.mxu0 }
  0xff   :  { %v143_v23 = vadd.f32 %v423_v18, %v142_v22 }
 0x100   :  { %v478_v24 = vpop.f32.mrf.mxu0 }
 0x101   :  { %v147_v26 = vmax.f32 %v143_v23, 0.0 }
 0x103   :  { %v148_v27 = vpack.c.bf16 %v147_v26, %v146_v25 }
 0x105   :  { %496 = vmatmul.mubr.bf16.vlgmr.msra.gmra.mxu1 %v148_v27 }
 0x1c5   :  { %v254_v32 = vpop.f32.mrf.mxu1 }
 0x1c6   :  { %v255_v34 = vadd.f32 %v426_v31, %v254_v32 }
 0x1c7   :  { %v497_v33 = vpop.f32.mrf.mxu1 }
 0x1c8   :  { %v261_v38 = vmax.f32 %v255_v34, 0.0 }
 0x1c9   :  { %v257_v35 = vpop.f32.mrf.mxu1 }
 0x1ca   :  { %v258_v36 = vadd.f32 %v426_v31, %v257_v35 }
 0x1cb   :  { %v498_v37 = vpop.f32.mrf.mxu1 }
 0x1cc   :  { %v262_v39 = vmax.f32 %v258_v36, 0.0 }
 0x1ce   :  { %v263_v40 = vpack.c.bf16 %v262_v39, %v261_v38 }
 0x1d0   :  { %516 = vmatmul.mubr.bf16.vlgmr.msra.gmra.mxu0 %v263_v40 }
 0x290   :  { %v369_v42 = vpop.f32.mrf.mxu0 }
 0x291   :  { %v370_v43 = vadd.f32 %v435_v41, %v369_v42 }
 0x292   :  { %v517_v44 = vpop.f32.mrf.mxu0 }
 0x293   :  { %376 = vmax.xlane.f32.xlu0 %v370_v43 }
 0x294   :  { %v372_v45 = vpop.f32.mrf.mxu0 }
 0x295   :  { %v373_v46 = vadd.f32 %v435_v41, %v372_v45 }
 0x296   :  { %v518_v47 = vpop.f32.mrf.mxu0 }
 0x297   :  { %378 = vmax.xlane.f32.xlu0 %v373_v46 }
 0x31c   :  { %v377_v48 = vpop.xlane.xlu0 %376 }
 0x31d   :  { %v380_v49 = vsub.f32 %v370_v43, %v377_v48 }
 0x31f   :  { %v382_v50 = vmul.f32 1.442695, %v380_v49 }
 0x320   :  { %v379_v51 = vpop.xlane.xlu0 %378 }
 0x321   :  { %547 = vpow2.f32 %v382_v50  ;;  %v381_v52 = vsub.f32 %v373_v46, %v379_v51 }
 0x323   :  { %v384_v53 = vmul.f32 1.442695, %v381_v52 }
 0x325   :  { %549 = vpow2.f32 %v384_v53 }
 0x32e   :  { %v548_v54 = vpop.eup %547 }
 0x32f   :  { %386 = vadd.xlane.f32.xlu1 %v548_v54 }
 0x332   :  { %v550_v55 = vpop.eup %549 }
 0x333   :  { %388 = vadd.xlane.f32.xlu1 %v550_v55 }
 0x3b8   :  { %v387_v56 = vpop.xlane.xlu1 %386 }
 0x3b9   :  { %551 = vrcp.f32 %v387_v56 }
 0x3bc   :  { %v389_v57 = vpop.xlane.xlu1 %388 }
 0x3bd   :  { %553 = vrcp.f32 %v389_v57 }
 0x3c6   :  { %v552_v58 = vpop.eup %551 }
 0x3c7   :  { %v392_v60 = vmul.f32 %v552_v58, %v548_v54 }
 0x3ca   :  { %v554_v59 = vpop.eup %553 }
 0x3cb   :  { %v393_v61 = vmul.f32 %v554_v59, %v550_v55 }
 0x3cd   :  { %v451_v62 = vpack.c.bf16 %v393_v61, %v392_v60 }
 0x3cf   :  { %452 = vst [vmem:[#allocation10] sm:$0xff] %v451_v62  }
 0x3d0   :  { %646 = shalt.err (!%p643_p10)
}
 0x3d1   :  { %415 = dma.vmem_to_hbm [thread:$0]  %s410_s6, 128, %s780_s7, [#allocation4], %s664_s27, %s664_s27, %s665_s28  }
 0x3d2   :  { %661 = dma.done.wait [#allocation4], 128  }
 0x3d3   :  { %662 = vsyncadd [#allocation4], 4294967168 }
 0x3d4   :  { %419 = vsyncpa [#allocation3], 1 }
 0x3d5   :  { %420 = vsyncpa [#allocation6], 1 }
 0x3d6   :  { %421 = vsyncpa [#allocation9], 1 }
 0x3d7   :  { %422 = vsyncpa [#allocation4], 1 }

</bundles_post_ra>
